<compile_context>
chip_gen: v7x
topology: tpu7x:2x2x1
jax: 0.10.0
libtpu: 0.0.40
codegen_flags: <defaults>
</compile_context>

<pallas_src>
import math

import jax
import jax.numpy as jnp
from jax import lax
from jax.experimental import pallas as pl
from jax.experimental.pallas import tpu as pltpu

LN_EPS = 1e-5


def _gelu_exact(x):
    # nn.GELU() default: exact erf-based GELU.
    return 0.5 * x * (1.0 + lax.erf(x * (1.0 / math.sqrt(2.0))))


def _silu(x):
    return x * jax.nn.sigmoid(x)


def _round_up(a, b):
    return (a + b - 1) // b * b


# --------------------------- hardware-aware defaults ------------------------

def _device_kind():
    try:
        return jax.devices()[0].device_kind.lower()
    except Exception:
        return ""


def _default_tiles():
    kind = _device_kind()
    if "v6" in kind:
        # Needs tm>=~512 to be MXU-bound on weight streaming (918 TF/s / 1.4 TB/s).
        return 512, 512
    if "v7" in kind:
        # 64 MiB VMEM per core; w_proj no longer resident, so tm=512 is fine,
        # but keep tn modest.
        return 512, 256
    # v5e (and unknown): ~240 flops/byte balance point -> tm=256 is enough.
    return 256, 512


def _vmem_limit_bytes():
    try:
        phys = int(pltpu.get_tpu_info().vmem_capacity_bytes)
    except Exception:
        phys = 64 * 2**20 if "v7" in _device_kind() else 128 * 2**20
    # 100 MiB on 128-MiB parts (v5e/v6e), 52 MiB on 64-MiB parts (v7x).
    return 100 * 2**20 if phys >= 128 * 2**20 else 52 * 2**20


# --------------------------------- kernels ----------------------------------

def proj_ln_gelu_kernel(x_ref, w_proj_ref, gamma_ref, beta_ref, g_ref):
    """Stage 1: linear_proj -> LayerNorm -> GELU, per token tile."""
    h = jnp.dot(x_ref[...], w_proj_ref[...],
                preferred_element_type=jnp.float32)          # f32 (tm, hidden)
    mean = jnp.mean(h, axis=-1, keepdims=True)
    c = h - mean
    var = jnp.mean(c * c, axis=-1, keepdims=True)
    hn = c * lax.rsqrt(var + LN_EPS)
    hn = hn * gamma_ref[...] + beta_ref[...]
    g_ref[...] = _gelu_exact(hn).astype(g_ref.dtype)         # bf16 for the MXU


def ffn_kernel(g_ref, w_gate_ref, w_h4_ref, w_out_ref, o_ref, acc_ref):
    """Stage 2: gated FFN.  Grid = (token tiles i, ffn tiles j); j reduces."""
    j = pl.program_id(1)

    g = g_ref[...]                                           # bf16 (tm, hidden)
    gate = jnp.dot(g, w_gate_ref[...],
                   preferred_element_type=jnp.float32)       # f32 (tm, tn)
    up = jnp.dot(g, w_h4_ref[...],
                 preferred_element_type=jnp.float32)         # f32 (tm, tn)
    inter = (_silu(gate) * up).astype(w_out_ref.dtype)       # bf16 (tm, tn)

    contrib = jnp.dot(inter, w_out_ref[...],
                      preferred_element_type=jnp.float32)    # f32 (tm, hidden)

    @pl.when(j == 0)
    def _():
        acc_ref[...] = contrib            # first chunk: write (no zero-fill)

    @pl.when(j > 0)
    def _():
        acc_ref[...] += contrib

    @pl.when(j == pl.num_programs(1) - 1)
    def _():
        o_ref[...] = acc_ref[...].astype(o_ref.dtype)


# --------------------------------- wrapper ----------------------------------

def prepare_params(params, *, compute_dtype=jnp.bfloat16, ffn_multiple=512):
    """Cast weights to bf16 and pad the FFN dimension ONCE, outside forward."""
    w_proj, gamma, beta, w_gate, w_h4, w_out = params
    hidden = w_proj.shape[1]
    ffn = w_gate.shape[1]
    ffn_p = _round_up(ffn, ffn_multiple)
    pad = ffn_p - ffn

    w_gate_c = w_gate.astype(compute_dtype)
    w_h4_c = w_h4.astype(compute_dtype)
    w_out_c = w_out.astype(compute_dtype)
    if pad:
        # Zero gate/up columns -> silu(0)*0 = 0, and matching w_out rows are
        # zero anyway, so the padded FFN slots contribute nothing.
        w_gate_c = jnp.pad(w_gate_c, ((0, 0), (0, pad)))
        w_h4_c = jnp.pad(w_h4_c, ((0, 0), (0, pad)))
        w_out_c = jnp.pad(w_out_c, ((0, pad), (0, 0)))

    return (w_proj.astype(compute_dtype),
            gamma.reshape(1, hidden).astype(jnp.float32),
            beta.reshape(1, hidden).astype(jnp.float32),
            w_gate_c, w_h4_c, w_out_c)


def glu_forward(x, prepared, *, tm=None, tn=None, out_dtype=jnp.bfloat16):
    """x: [..., in_features] -> [..., hidden_size] (out_dtype, default bf16)."""
    w_proj, gamma2, beta2, w_gate, w_h4, w_out = prepared
    in_features, hidden = w_proj.shape
    ffn_p = w_gate.shape[1]
    compute_dtype = w_proj.dtype

    tm_d, tn_d = _default_tiles()
    tm = tm_d if tm is None else tm
    tn = tn_d if tn is None else tn
    tn = min(tn, ffn_p)
    assert ffn_p % tn == 0, "padded ffn must be divisible by tn"
    assert tn % 128 == 0 or tn == ffn_p, "tn should be lane-dense"

    lead_shape = x.shape[:-1]
    M = math.prod(lead_shape) if lead_shape else 1

    # Don't pay full-tile cost for tiny batches.
    tm = max(min(tm, _round_up(max(M, 1), 128)), 8)
    assert tm % 8 == 0
    Mp = _round_up(max(M, 1), tm)

    x2 = x.reshape(M, in_features).astype(compute_dtype)
    if Mp != M:
        x2 = jnp.pad(x2, ((0, Mp - M), (0, 0)))

    vmem_limit = _vmem_limit_bytes()

    # ---- stage 1: proj + LayerNorm + GELU -> g (bf16) ----
    g = pl.pallas_call(
        proj_ln_gelu_kernel,
        out_shape=jax.ShapeDtypeStruct((Mp, hidden), compute_dtype),
        grid_spec=pltpu.PrefetchScalarGridSpec(
            num_scalar_prefetch=0,
            grid=(Mp // tm,),
            in_specs=[
                pl.BlockSpec((tm, in_features), lambda i: (i, 0)),      # x tile
                pl.BlockSpec((in_features, hidden), lambda i: (0, 0)),  # w_proj
                pl.BlockSpec((1, hidden), lambda i: (0, 0)),            # gamma
                pl.BlockSpec((1, hidden), lambda i: (0, 0)),            # beta
            ],
            out_specs=pl.BlockSpec((tm, hidden), lambda i: (i, 0)),
        ),
        compiler_params=pltpu.CompilerParams(
            dimension_semantics=("parallel",),
            vmem_limit_bytes=vmem_limit,
        ),
    )(x2, w_proj, gamma2, beta2)

    # ---- stage 2: gated FFN with FFN-axis reduction ----
    out2 = pl.pallas_call(
        ffn_kernel,
        out_shape=jax.ShapeDtypeStruct((Mp, hidden), out_dtype),
        grid_spec=pltpu.PrefetchScalarGridSpec(
            num_scalar_prefetch=0,
            grid=(Mp // tm, ffn_p // tn),
            in_specs=[
                pl.BlockSpec((tm, hidden), lambda i, j: (i, 0)),   # g tile
                pl.BlockSpec((hidden, tn), lambda i, j: (0, j)),   # w_gate chunk
                pl.BlockSpec((hidden, tn), lambda i, j: (0, j)),   # w_h4 chunk
                pl.BlockSpec((tn, hidden), lambda i, j: (j, 0)),   # w_out chunk
            ],
            out_specs=pl.BlockSpec((tm, hidden), lambda i, j: (i, 0)),
            scratch_shapes=[pltpu.VMEM((tm, hidden), jnp.float32)],  # f32 acc
        ),
        compiler_params=pltpu.CompilerParams(
            dimension_semantics=("parallel", "arbitrary"),
            vmem_limit_bytes=vmem_limit,
        ),
    )(g, w_gate, w_h4, w_out)

    out2 = out2[:M]
    return out2.reshape(*lead_shape, hidden)


# --------------------------- reference & test setup --------------------------

def glu_reference(x, params, compute_dtype=jnp.float32):
    """Pure-JAX reference matching the PyTorch forward (optionally with the
    same bf16 matmul inputs / f32 accumulation as the kernel)."""
    w_proj, gamma, beta, w_gate, w_h4, w_out = params
    cd = compute_dtype
    f32 = jnp.float32
    h = jnp.dot(x.astype(cd), w_proj.astype(cd), preferred_element_type=f32)
    mean = jnp.mean(h, -1, keepdims=True)
    var = jnp.mean((h - mean) ** 2, -1, keepdims=True)
    hn = (h - mean) * lax.rsqrt(var + LN_EPS) * gamma.astype(f32) + beta.astype(f32)
    g = _gelu_exact(hn).astype(cd)
    gate = jnp.dot(g, w_gate.astype(cd), preferred_element_type=f32)
    up = jnp.dot(g, w_h4.astype(cd), preferred_element_type=f32)
    inter = (_silu(gate) * up).astype(cd)
    out = jnp.dot(inter, w_out.astype(cd), preferred_element_type=f32)
    return out


def init_params(key, in_features, hidden_size, ffn_hidden_size, dtype=jnp.float32):
    ks = jax.random.split(key, 6)
    scale = 0.02
    w_proj = scale * jax.random.normal(ks[0], (in_features, hidden_size), dtype)
    gamma = 1.0 + scale * jax.random.normal(ks[1], (hidden_size,), dtype)
    beta = scale * jax.random.normal(ks[2], (hidden_size,), dtype)
    w_gate = scale * jax.random.normal(ks[3], (hidden_size, ffn_hidden_size), dtype)
    w_h4 = scale * jax.random.normal(ks[4], (hidden_size, ffn_hidden_size), dtype)
    w_out = scale * jax.random.normal(ks[5], (ffn_hidden_size, hidden_size), dtype)
    return (w_proj, gamma, beta, w_gate, w_h4, w_out)


if __name__ == "__main__":
    key = jax.random.PRNGKey(0)
    k_x, k_p = jax.random.split(key)

    # Small shapes consistent with the module.  ffn=640 (not a multiple of 512)
    # exercises the FFN zero-padding path AND multiple reduction (j) steps.
    batch, seq = 2, 8
    in_features = 256
    hidden_size = 256      # config.hidden_size
    ffn_hidden_size = 640  # config.ffn_hidden_size (padded to 1024 internally)

    x = jax.random.normal(k_x, (batch, seq, in_features), jnp.float32)
    params = init_params(k_p, in_features, hidden_size, ffn_hidden_size)

    # Weights are cast to bf16 and FFN-padded ONCE, outside the forward.
    prepared = prepare_params(params)

    out = glu_forward(x, prepared)           # default bf16 output
    out = jax.block_until_ready(out)
    assert out.shape == (batch, seq, hidden_size)
    assert bool(jnp.all(jnp.isfinite(out)))

    # Compare against a reference with matching bf16 matmul inputs / f32 accum.
    ref = glu_reference(x, params, compute_dtype=jnp.bfloat16)
    assert jnp.allclose(out.astype(jnp.float32), ref, atol=1e-2, rtol=1e-2), \
        "mismatch vs reference"

    print("KERNEL_OK")
</pallas_src>

<mosaic_0001>
module attributes {stable_mosaic.version = 11 : i64} {
  func.func @proj_ln_gelu_kernel(%arg0: i32, %arg1: memref<128x256xbf16, #tpu.memory_space<vmem>>, %arg2: memref<256x256xbf16, #tpu.memory_space<vmem>>, %arg3: memref<1x256xf32, #tpu.memory_space<vmem>>, %arg4: memref<1x256xf32, #tpu.memory_space<vmem>>, %arg5: memref<128x256xbf16, #tpu.memory_space<vmem>>) attributes {dimension_semantics = [#tpu.dimension_semantics<parallel>], iteration_bounds = array<i64: 1>, scalar_prefetch = 0 : i64, scratch_operands = 0 : i64, tpu.core_type = #tpu.core_type<tc>, window_params = [{transform_indices = @transform_0, window_bounds = array<i64: 128, 256>}, {pipeline_mode = #tpu.pipeline_mode<synchronous>, transform_indices = @transform_1, window_bounds = array<i64: 256, 256>}, {pipeline_mode = #tpu.pipeline_mode<synchronous>, transform_indices = @transform_2, window_bounds = array<i64: 1, 256>}, {pipeline_mode = #tpu.pipeline_mode<synchronous>, transform_indices = @transform_3, window_bounds = array<i64: 1, 256>}, {transform_indices = @transform_4, window_bounds = array<i64: 128, 256>}]} {
    %c0 = arith.constant 0 : index
    %c0_0 = arith.constant 0 : index
    %0 = vector.load %arg1[%c0, %c0_0] : memref<128x256xbf16, #tpu.memory_space<vmem>>, vector<128x256xbf16>
    %c0_1 = arith.constant 0 : index
    %c0_2 = arith.constant 0 : index
    %1 = vector.load %arg2[%c0_1, %c0_2] : memref<256x256xbf16, #tpu.memory_space<vmem>>, vector<256x256xbf16>
    %cst = arith.constant dense<0.000000e+00> : vector<128x256xf32>
    %2 = tpu.matmul %0, %1, %cst {dimension_numbers = #tpu.dot_dimension_numbers<[1], [0], [0], [1], [0, 0, 1, 1], [], []>} : vector<128x256xbf16>, vector<256x256xbf16>, vector<128x256xf32> -> vector<128x256xf32>
    %cst_3 = arith.constant dense<0.000000e+00> : vector<128xf32>
    %3 = vector.multi_reduction <add>, %2, %cst_3 [1] : vector<128x256xf32> to vector<128xf32>
    %4 = vector.shape_cast %3 : vector<128xf32> to vector<128x1xf32>
    %cst_4 = arith.constant 2.560000e+02 : f32
    %5 = vector.broadcast %cst_4 : f32 to vector<128x1xf32>
    %6 = arith.divf %4, %5 : vector<128x1xf32>
    %7 = vector.broadcast %6 : vector<128x1xf32> to vector<128x256xf32>
    %8 = arith.subf %2, %7 : vector<128x256xf32>
    %9 = arith.mulf %8, %8 : vector<128x256xf32>
    %cst_5 = arith.constant dense<0.000000e+00> : vector<128xf32>
    %10 = vector.multi_reduction <add>, %9, %cst_5 [1] : vector<128x256xf32> to vector<128xf32>
    %11 = vector.shape_cast %10 : vector<128xf32> to vector<128x1xf32>
    %cst_6 = arith.constant 2.560000e+02 : f32
    %12 = vector.broadcast %cst_6 : f32 to vector<128x1xf32>
    %13 = arith.divf %11, %12 : vector<128x1xf32>
    %cst_7 = arith.constant 9.99999974E-6 : f32
    %14 = vector.broadcast %cst_7 : f32 to vector<128x1xf32>
    %15 = arith.addf %13, %14 : vector<128x1xf32>
    %16 = math.rsqrt %15 : vector<128x1xf32>
    %17 = vector.broadcast %16 : vector<128x1xf32> to vector<128x256xf32>
    %18 = arith.mulf %8, %17 : vector<128x256xf32>
    %c0_8 = arith.constant 0 : index
    %c0_9 = arith.constant 0 : index
    %19 = vector.load %arg3[%c0_8, %c0_9] : memref<1x256xf32, #tpu.memory_space<vmem>>, vector<1x256xf32>
    %20 = vector.broadcast %19 : vector<1x256xf32> to vector<128x256xf32>
    %21 = arith.mulf %18, %20 : vector<128x256xf32>
    %c0_10 = arith.constant 0 : index
    %c0_11 = arith.constant 0 : index
    %22 = vector.load %arg4[%c0_10, %c0_11] : memref<1x256xf32, #tpu.memory_space<vmem>>, vector<1x256xf32>
    %23 = vector.broadcast %22 : vector<1x256xf32> to vector<128x256xf32>
    %24 = arith.addf %21, %23 : vector<128x256xf32>
    %cst_12 = arith.constant 5.000000e-01 : f32
    %25 = vector.broadcast %cst_12 : f32 to vector<128x256xf32>
    %26 = arith.mulf %25, %24 : vector<128x256xf32>
    %cst_13 = arith.constant 0.707106769 : f32
    %27 = vector.broadcast %cst_13 : f32 to vector<128x256xf32>
    %28 = arith.mulf %24, %27 : vector<128x256xf32>
    %29 = math.erf %28 : vector<128x256xf32>
    %cst_14 = arith.constant 1.000000e+00 : f32
    %30 = vector.broadcast %cst_14 : f32 to vector<128x256xf32>
    %31 = arith.addf %30, %29 : vector<128x256xf32>
    %32 = arith.mulf %26, %31 : vector<128x256xf32>
    %33 = arith.truncf %32 : vector<128x256xf32> to vector<128x256xbf16>
    %c0_15 = arith.constant 0 : index
    %c0_16 = arith.constant 0 : index
    %34 = vector.load %arg5[%c0_15, %c0_16] : memref<128x256xbf16, #tpu.memory_space<vmem>>, vector<128x256xbf16>
    tpu.vector_store %arg5[%c0_15, %c0_16], %33 {strides = array<i32>} : memref<128x256xbf16, #tpu.memory_space<vmem>>, vector<128x256xbf16>,
    return
  }
  func.func @transform_0(%arg0: i32) -> (i32, i32) {
    %c0_i32 = arith.constant 0 : i32
    %c0_i32_0 = arith.constant 0 : i32
    return %arg0, %c0_i32 : i32, i32
  }
  func.func @transform_1(%arg0: i32) -> (i32, i32) {
    %c0_i32 = arith.constant 0 : i32
    %c0_i32_0 = arith.constant 0 : i32
    %c0_i32_1 = arith.constant 0 : i32
    return %c0_i32, %c0_i32_0 : i32, i32
  }
  func.func @transform_2(%arg0: i32) -> (i32, i32) {
    %c0_i32 = arith.constant 0 : i32
    %c0_i32_0 = arith.constant 0 : i32
    %c0_i32_1 = arith.constant 0 : i32
    return %c0_i32, %c0_i32_0 : i32, i32
  }
  func.func @transform_3(%arg0: i32) -> (i32, i32) {
    %c0_i32 = arith.constant 0 : i32
    %c0_i32_0 = arith.constant 0 : i32
    %c0_i32_1 = arith.constant 0 : i32
    return %c0_i32, %c0_i32_0 : i32, i32
  }
  func.func @transform_4(%arg0: i32) -> (i32, i32) {
    %c0_i32 = arith.constant 0 : i32
    %c0_i32_0 = arith.constant 0 : i32
    return %arg0, %c0_i32 : i32, i32
  }
}

</mosaic_0001>

<bundles_post_ra>
// kernel: tpu_custom_call.1
= control target key start
LH: loop header
LB: loop body
LE: loop exit
PB: predicated region body
PF: predicated region fallthrough
CT: control target
= control target key end

     0   :  { %9 = vsyncpa [#allocation3], 0  ;;  %s2009_s0 = inlined_call_operand.hbm [shape: bf16[128,256], index: 0, kind: input, shape index: {}]   ;;  %s2010_s1 = inlined_call_operand.hbm [shape: bf16[256,256], index: 1, kind: input, shape index: {}]   ;;  %s2011_s2 = inlined_call_operand.hbm [shape: f32[1,256], index: 2, kind: input, shape index: {}]   ;;  %s2012_s3 = inlined_call_operand.hbm [shape: f32[1,256], index: 3, kind: input, shape index: {}]   ;;  %s2013_s4 = inlined_call_operand.hbm [shape: bf16[128,256], index: 4, kind: output, shape index: {}]  }
   0x1   :  { %10 = vsyncpa [#allocation6], 0 }
   0x2   :  { %11 = vsyncpa [#allocation9], 0 }
   0x3   :  { %12 = vsyncpa [#allocation4], 0  ;;  %s1511_s15 = smov [#allocation5]   ;;  %s1512_s17 = smov [#allocation2]  }
   0x4   :  { %s30_s16 = sshll.u32 %s1511_s15, 4  ;;  %s18_s18 = sshll.u32 %s1512_s17, 4  ;;  %s31_s16 = int_to_ptr.vmem [resolvable:$true] %s30_s16  ;;  %s1543_s18 = int_to_ptr.vmem [resolvable:$true] %s18_s18 }
   0x5   :  { %s1393_s21 = scalar_lea.hbm %s2010_s1, 4096 }
   0x6   :  { %p1394_p0 = scmp.ne.s32.totalorder %s2010_s1, %s1393_s21  ;;  %p1397_p1 = scmp.lt.u32.totalorder %s1393_s21, %s2010_s1 }
   0x8   :  { %p1399_p2 = pnand %p1397_p1, %p1394_p0 }
   0xa   :  { %1402 = shalt.err (!%p1399_p2)
}
   0xb   :  { %s1403_s26 = scalar_lea.vmem %s31_s16, 4096  ;;  %p1408_p4 = scmp.lt.s32.totalorder %s31_s16, %s31_s16 }
   0xc   :  { %p1404_p3 = scmp.ne.s32.totalorder %s31_s16, %s1403_s26  ;;  %p1409_p5 = scmp.lt.s32.totalorder %s1403_s26, %s1403_s26 }
   0xe   :  { %p1410_p6 = por %p1409_p5, %p1408_p4 }
  0x10   :  { %p1411_p7 = pnand %p1410_p6, %p1404_p3 }
  0x12   :  { %1414 = shalt.err (!%p1411_p7)
}
  0x13   :  { %s1513_s27 = smov 128   ;;  %s1514_s28 = smov 8  }
  0x14   :  { %36 = dma.hbm_to_vmem [thread:$0]  %s2010_s1, 4096, %s31_s16, [#allocation6], %s1513_s27, %s1513_s27, %s1514_s28  }
  0x15   :  { %s1415_s7 = scalar_lea.hbm %s2009_s0, 2048 }
  0x16   :  { %p1416_p8 = scmp.ne.s32.totalorder %s2009_s0, %s1415_s7  ;;  %p1419_p9 = scmp.lt.u32.totalorder %s1415_s7, %s2009_s0 }
  0x18   :  { %p1421_p10 = pnand %p1419_p9, %p1416_p8 }
  0x1a   :  { %1424 = shalt.err (!%p1421_p10)
}
  0x1b   :  { %s1425_s12 = scalar_lea.vmem %s1543_s18, 2048  ;;  %p1430_p12 = scmp.lt.s32.totalorder %s1543_s18, %s1543_s18 }
  0x1c   :  { %p1426_p11 = scmp.ne.s32.totalorder %s1543_s18, %s1425_s12  ;;  %p1431_p13 = scmp.lt.s32.totalorder %s1425_s12, %s1425_s12 }
  0x1e   :  { %p1432_p0 = por %p1431_p13, %p1430_p12 }
  0x20   :  { %p1433_p1 = pnand %p1432_p0, %p1426_p11 }
  0x22   :  { %1436 = shalt.err (!%p1433_p1)
}
  0x23   :  { %24 = dma.hbm_to_vmem [thread:$0]  %s2009_s0, 2048, %s1543_s18, [#allocation3], %s1513_s27, %s1513_s27, %s1514_s28  }
  0x24   :  { %s1515_s14 = smov [#allocation7]   ;;  %s1516_s16 = smov [#allocation8]  }
  0x25   :  { %s43_s15 = sshll.u32 %s1515_s14, 4  ;;  %s53_s17 = sshll.u32 %s1516_s16, 4  ;;  %s44_s15 = int_to_ptr.vmem [resolvable:$true] %s43_s15  ;;  %s54_s17 = int_to_ptr.vmem [resolvable:$true] %s53_s17 }
  0x26   :  { %s1437_s21 = scalar_lea.hbm %s2011_s2, 32 }
  0x27   :  { %p1438_p2 = scmp.ne.s32.totalorder %s2011_s2, %s1437_s21  ;;  %p1441_p3 = scmp.lt.u32.totalorder %s1437_s21, %s2011_s2 }
  0x29   :  { %p1443_p4 = pnand %p1441_p3, %p1438_p2 }
  0x2b   :  { %1446 = shalt.err (!%p1443_p4)
}
  0x2c   :  { %s1447_s0 = scalar_lea.vmem %s44_s15, 32  ;;  %p1452_p6 = scmp.lt.s32.totalorder %s44_s15, %s44_s15 }
  0x2d   :  { %p1448_p5 = scmp.ne.s32.totalorder %s44_s15, %s1447_s0  ;;  %p1453_p7 = scmp.lt.s32.totalorder %s1447_s0, %s1447_s0 }
  0x2f   :  { %p1454_p8 = por %p1453_p7, %p1452_p6 }
  0x31   :  { %p1455_p9 = pnand %p1454_p8, %p1448_p5 }
  0x33   :  { %1458 = shalt.err (!%p1455_p9)
}
  0x34   :  { %46 = dma.hbm_to_vmem [thread:$0]  %s2011_s2, 32, %s44_s15, [#allocation6]  }
  0x35   :  { %s1459_s5 = scalar_lea.hbm %s2012_s3, 32 }
  0x36   :  { %p1460_p10 = scmp.ne.s32.totalorder %s2012_s3, %s1459_s5  ;;  %p1463_p11 = scmp.lt.u32.totalorder %s1459_s5, %s2012_s3 }
  0x38   :  { %p1465_p12 = pnand %p1463_p11, %p1460_p10 }
  0x3a   :  { %1468 = shalt.err (!%p1465_p12)
}
  0x3b   :  { %s1469_s10 = scalar_lea.vmem %s54_s17, 32  ;;  %p1474_p0 = scmp.lt.s32.totalorder %s54_s17, %s54_s17 }
  0x3c   :  { %p1470_p13 = scmp.ne.s32.totalorder %s54_s17, %s1469_s10  ;;  %p1475_p1 = scmp.lt.s32.totalorder %s1469_s10, %s1469_s10 }
  0x3e   :  { %p1476_p2 = por %p1475_p1, %p1474_p0 }
  0x40   :  { %p1477_p3 = pnand %p1476_p2, %p1470_p13 }
  0x42   :  { %1480 = shalt.err (!%p1477_p3)
}
  0x43   :  { %56 = dma.hbm_to_vmem [thread:$0]  %s2012_s3, 32, %s54_s17, [#allocation9]  }
  0x44   :  { %1503 = dma.done.wait [#allocation3], 2048  }
  0x45   :  { %1504 = vsyncadd [#allocation3], 4294965248 }
  0x46   :  { %1505 = dma.done.wait [#allocation6], 4128  }
  0x47   :  { %1506 = vsyncadd [#allocation6], 4294963168 }
  0x48   :  { %1507 = dma.done.wait [#allocation9], 32  }
  0x49   :  { %1508 = vsyncadd [#allocation9], 4294967264  ;;  %v1225_v0 = vld [vmem:[#allocation5 + $0x4] ss:$8 sps:$4 sm:$0xff]   ;;  %v1227_v1 = vld [vmem:[#allocation5] ss:$8 sps:$4 sm:$0xff]  }
  0x4a   :  { %357 = vmatprep.subr.bf16.mxu0 %v1225_v0  ;;  %1186 = vmatprep.subr.bf16.mxu1 %v1225_v0  ;;  %v1228_v2 = vld [vmem:[#allocation5 + $0x14] ss:$8 sps:$4 sm:$0xff]   ;;  %v1230_v3 = vld [vmem:[#allocation5 + $0x10] ss:$8 sps:$4 sm:$0xff]   ;;  %v1231_v4 = vld [vmem:[#allocation5 + $0x24] ss:$8 sps:$4 sm:$0xff]  }
  0x4b   :  { %358 = vmatpush1.bf16.msra.mxu0 %v1227_v1  ;;  %1202 = vmatpush1.bf16.msra.mxu1 %v1227_v1  ;;  %v1233_v5 = vld [vmem:[#allocation5 + $0x20] ss:$8 sps:$4 sm:$0xff]   ;;  %v1234_v6 = vld [vmem:[#allocation5 + $0x34] ss:$8 sps:$4 sm:$0xff]   ;;  %v1236_v7 = vld [vmem:[#allocation5 + $0x30] ss:$8 sps:$4 sm:$0xff]  }
  0x4c   :  { %359 = vmatprep.subr.bf16.mxu0 %v1228_v2  ;;  %1187 = vmatprep.subr.bf16.mxu1 %v1228_v2  ;;  %v1237_v8 = vld [vmem:[#allocation5 + $0x44] ss:$8 sps:$4 sm:$0xff]   ;;  %v1239_v9 = vld [vmem:[#allocation5 + $0x40] ss:$8 sps:$4 sm:$0xff]   ;;  %v1240_v10 = vld [vmem:[#allocation5 + $0x54] ss:$8 sps:$4 sm:$0xff]  }
  0x4d   :  { %v1242_v11 = vld [vmem:[#allocation5 + $0x50] ss:$8 sps:$4 sm:$0xff]   ;;  %v1243_v12 = vld [vmem:[#allocation5 + $0x64] ss:$8 sps:$4 sm:$0xff]   ;;  %v1245_v14 = vld [vmem:[#allocation5 + $0x60] ss:$8 sps:$4 sm:$0xff]  }
  0x4e   :  { %v1275_v13 = vld [vmem:[#allocation2 + $0x4] ss:$8 sps:$4 sm:$0xff]   ;;  %v1246_v16 = vld [vmem:[#allocation5 + $0x74] ss:$8 sps:$4 sm:$0xff]   ;;  %v1248_v17 = vld [vmem:[#allocation5 + $0x70] ss:$8 sps:$4 sm:$0xff]  }
  0x4f   :  { %360 = vmatpush1.bf16.msra.mxu0 %v1230_v3  ;;  %1203 = vmatpush1.bf16.msra.mxu1 %v1230_v3  ;;  %v1278_v15 = vld [vmem:[#allocation2 + $0x44] ss:$8 sps:$4 sm:$0xff]   ;;  %v1251_v19 = vld [vmem:[#allocation5 + $0x80] ss:$8 sps:$4 sm:$0xff]   ;;  %v1252_v20 = vld [vmem:[#allocation5 + $0x94] ss:$8 sps:$4 sm:$0xff]  }
  0x50   :  { %361 = vmatprep.subr.bf16.mxu0 %v1231_v4  ;;  %1188 = vmatprep.subr.bf16.mxu1 %v1231_v4  ;;  %v1249_v18 = vld [vmem:[#allocation5 + $0x84] ss:$8 sps:$4 sm:$0xff]   ;;  %v1254_v21 = vld [vmem:[#allocation5 + $0x90] ss:$8 sps:$4 sm:$0xff]   ;;  %v1257_v23 = vld [vmem:[#allocation5 + $0xa0] ss:$8 sps:$4 sm:$0xff]  }
  0x51   :  { %389 = vmatprep.mubr.bf16.mxu0 %v1275_v13  ;;  %429 = vmatprep.mubr.bf16.mxu1 %v1278_v15  ;;  %v1255_v22 = vld [vmem:[#allocation5 + $0xa4] ss:$8 sps:$4 sm:$0xff]   ;;  %v1258_v24 = vld [vmem:[#allocation5 + $0xb4] ss:$8 sps:$4 sm:$0xff]   ;;  %v1260_v25 = vld [vmem:[#allocation5 + $0xb0] ss:$8 sps:$4 sm:$0xff]  }
  0x52   :  { %v1261_v26 = vld [vmem:[#allocation5 + $0xc4] ss:$8 sps:$4 sm:$0xff]   ;;  %v1263_v27 = vld [vmem:[#allocation5 + $0xc0] ss:$8 sps:$4 sm:$0xff]   ;;  %v1264_v28 = vld [vmem:[#allocation5 + $0xd4] ss:$8 sps:$4 sm:$0xff]  }
  0x53   :  { %362 = vmatpush1.bf16.msra.mxu0 %v1233_v5  ;;  %1204 = vmatpush1.bf16.msra.mxu1 %v1233_v5  ;;  %v1266_v29 = vld [vmem:[#allocation5 + $0xd0] ss:$8 sps:$4 sm:$0xff]   ;;  %v1267_v30 = vld [vmem:[#allocation5 + $0xe4] ss:$8 sps:$4 sm:$0xff]   ;;  %v1269_v31 = vld [vmem:[#allocation5 + $0xe0] ss:$8 sps:$4 sm:$0xff]  }
  0x54   :  { %363 = vmatprep.subr.bf16.mxu0 %v1234_v6  ;;  %1189 = vmatprep.subr.bf16.mxu1 %v1234_v6  ;;  %v1270_v32 = vld [vmem:[#allocation5 + $0xf4] ss:$8 sps:$4 sm:$0xff]   ;;  %v1272_v33 = vld [vmem:[#allocation5 + $0xf0] ss:$8 sps:$4 sm:$0xff]   ;;  %v1273_v34 = vld [vmem:[#allocation2] ss:$8 sps:$4 sm:$0xff]  }
  0x55   :  { %v1276_v35 = vld [vmem:[#allocation2 + $0x40] ss:$8 sps:$4 sm:$0xff]   ;;  %v1279_v36 = vld [vmem:[#allocation2 + $0x14] ss:$8 sps:$4 sm:$0xff]   ;;  %v1281_v38 = vld [vmem:[#allocation2 + $0x10] ss:$8 sps:$4 sm:$0xff]  }
  0x56   :  { %v1282_v37 = vld [vmem:[#allocation2 + $0x54] ss:$8 sps:$4 sm:$0xff]   ;;  %v1284_v39 = vld [vmem:[#allocation2 + $0x50] ss:$8 sps:$4 sm:$0xff]   ;;  %v1285_v40 = vld [vmem:[#allocation2 + $0x24] ss:$8 sps:$4 sm:$0xff]  }
  0x57   :  { %364 = vmatpush1.bf16.msra.mxu0 %v1236_v7  ;;  %1205 = vmatpush1.bf16.msra.mxu1 %v1236_v7  ;;  %v1288_v41 = vld [vmem:[#allocation2 + $0x64] ss:$8 sps:$4 sm:$0xff]   ;;  %v1287_v42 = vld [vmem:[#allocation2 + $0x20] ss:$8 sps:$4 sm:$0xff]   ;;  %v1291_v44 = vld [vmem:[#allocation2 + $0x34] ss:$8 sps:$4 sm:$0xff]  }
  0x58   :  { %365 = vmatprep.subr.bf16.mxu0 %v1237_v8  ;;  %1190 = vmatprep.subr.bf16.mxu1 %v1237_v8  ;;  %v1290_v43 = vld [vmem:[#allocation2 + $0x60] ss:$8 sps:$4 sm:$0xff]   ;;  %v1294_v45 = vld [vmem:[#allocation2 + $0x74] ss:$8 sps:$4 sm:$0xff]   ;;  %v1293_v46 = vld [vmem:[#allocation2 + $0x30] ss:$8 sps:$4 sm:$0xff]  }
  0x59   :  { %v1296_v47 = vld [vmem:[#allocation2 + $0x70] ss:$8 sps:$4 sm:$0xff]   ;;  %s1517_s3 = smov [#allocation10]  }
  0x5a   :  { %s1092_s12 = sshll.u32 %s1517_s3, 4  ;;  %s1093_s12 = int_to_ptr.vmem [resolvable:$true] %s1092_s12 }
  0x5b   :  { %366 = vmatpush1.bf16.msra.mxu0 %v1239_v9  ;;  %1206 = vmatpush1.bf16.msra.mxu1 %v1239_v9  ;;  %s1481_s1 = scalar_lea.vmem %s1093_s12, 2048  ;;  %p1486_p5 = scmp.lt.s32.totalorder %s1093_s12, %s1093_s12 }
  0x5c   :  { %367 = vmatprep.subr.bf16.mxu0 %v1240_v10  ;;  %1191 = vmatprep.subr.bf16.mxu1 %v1240_v10  ;;  %p1482_p4 = scmp.ne.s32.totalorder %s1093_s12, %s1481_s1  ;;  %p1487_p6 = scmp.lt.s32.totalorder %s1481_s1, %s1481_s1 }
  0x5e   :  { %p1488_p7 = por %p1487_p6, %p1486_p5 }
  0x5f   :  { %368 = vmatpush1.bf16.msra.mxu0 %v1242_v11  ;;  %1207 = vmatpush1.bf16.msra.mxu1 %v1242_v11 }
  0x60   :  { %369 = vmatprep.subr.bf16.mxu0 %v1243_v12  ;;  %1192 = vmatprep.subr.bf16.mxu1 %v1243_v12  ;;  %p1489_p8 = pnand %p1488_p7, %p1482_p4 }
  0x63   :  { %370 = vmatpush1.bf16.msra.mxu0 %v1245_v14  ;;  %1208 = vmatpush1.bf16.msra.mxu1 %v1245_v14 }
  0x64   :  { %371 = vmatprep.subr.bf16.mxu0 %v1246_v16  ;;  %1193 = vmatprep.subr.bf16.mxu1 %v1246_v16 }
  0x67   :  { %372 = vmatpush1.bf16.msra.mxu0 %v1248_v17  ;;  %1209 = vmatpush1.bf16.msra.mxu1 %v1248_v17 }
  0x68   :  { %373 = vmatprep.subr.bf16.mxu0 %v1249_v18  ;;  %1194 = vmatprep.subr.bf16.mxu1 %v1249_v18 }
  0x6b   :  { %374 = vmatpush1.bf16.msra.mxu0 %v1251_v19  ;;  %1210 = vmatpush1.bf16.msra.mxu1 %v1251_v19 }
  0x6c   :  { %375 = vmatprep.subr.bf16.mxu0 %v1252_v20  ;;  %1195 = vmatprep.subr.bf16.mxu1 %v1252_v20 }
  0x6f   :  { %376 = vmatpush1.bf16.msra.mxu0 %v1254_v21  ;;  %1211 = vmatpush1.bf16.msra.mxu1 %v1254_v21 }
  0x70   :  { %377 = vmatprep.subr.bf16.mxu0 %v1255_v22  ;;  %1196 = vmatprep.subr.bf16.mxu1 %v1255_v22 }
  0x73   :  { %378 = vmatpush1.bf16.msra.mxu0 %v1257_v23  ;;  %1212 = vmatpush1.bf16.msra.mxu1 %v1257_v23 }
  0x74   :  { %379 = vmatprep.subr.bf16.mxu0 %v1258_v24  ;;  %1197 = vmatprep.subr.bf16.mxu1 %v1258_v24 }
  0x77   :  { %380 = vmatpush1.bf16.msra.mxu0 %v1260_v25  ;;  %1213 = vmatpush1.bf16.msra.mxu1 %v1260_v25 }
  0x78   :  { %381 = vmatprep.subr.bf16.mxu0 %v1261_v26  ;;  %1198 = vmatprep.subr.bf16.mxu1 %v1261_v26 }
  0x7b   :  { %382 = vmatpush1.bf16.msra.mxu0 %v1263_v27  ;;  %1214 = vmatpush1.bf16.msra.mxu1 %v1263_v27 }
  0x7c   :  { %383 = vmatprep.subr.bf16.mxu0 %v1264_v28  ;;  %1199 = vmatprep.subr.bf16.mxu1 %v1264_v28 }
  0x7f   :  { %384 = vmatpush1.bf16.msra.mxu0 %v1266_v29  ;;  %1215 = vmatpush1.bf16.msra.mxu1 %v1266_v29 }
  0x80   :  { %385 = vmatprep.subr.bf16.mxu0 %v1267_v30  ;;  %1200 = vmatprep.subr.bf16.mxu1 %v1267_v30 }
  0x83   :  { %386 = vmatpush1.bf16.msra.mxu0 %v1269_v31  ;;  %1216 = vmatpush1.bf16.msra.mxu1 %v1269_v31 }
  0x84   :  { %387 = vmatprep.subr.bf16.mxu0 %v1270_v32  ;;  %1201 = vmatprep.subr.bf16.mxu1 %v1270_v32 }
  0x87   :  { %388 = vmatpush1.bf16.msra.mxu0 %v1272_v33  ;;  %1217 = vmatpush1.bf16.msra.mxu1 %v1272_v33 }
  0x8a   :  { %390 = vmatmul.mubr.bf16.vlgmr.msra.gmra.mrb[0].mxu0 %v1273_v34  ;;  %430 = vmatmul.mubr.bf16.vlgmr.msra.gmra.mrb[0].mxu1 %v1276_v35 }
  0x8b   :  { %399 = vmatprep.mubr.bf16.mxu0 %v1279_v36  ;;  %439 = vmatprep.mubr.bf16.mxu1 %v1282_v37 }
  0x92   :  { %400 = vmatmul.mubr.bf16.gmra.mrb[4].mxu0 %v1281_v38  ;;  %440 = vmatmul.mubr.bf16.gmra.mrb[4].mxu1 %v1284_v39 }
  0x93   :  { %409 = vmatprep.mubr.bf16.mxu0 %v1285_v40  ;;  %449 = vmatprep.mubr.bf16.mxu1 %v1288_v41 }
  0x9a   :  { %410 = vmatmul.mubr.bf16.gmra.mrb[8].mxu0 %v1287_v42  ;;  %450 = vmatmul.mubr.bf16.gmra.mrb[8].mxu1 %v1290_v43 }
  0x9b   :  { %419 = vmatprep.mubr.bf16.mxu0 %v1291_v44  ;;  %459 = vmatprep.mubr.bf16.mxu1 %v1294_v45 }
  0xa2   :  { %420 = vmatmul.mubr.bf16.gmra.mrb[12].mxu0 %v1293_v46  ;;  %460 = vmatmul.mubr.bf16.gmra.mrb[12].mxu1 %v1296_v47 }
 0x15d   :  { %v1604_v48 = vpop.f32.mrb[0].mxu0  ;;  %v1606_v49 = vpop.f32.mrb[0].mxu1 }
 0x15e   :  { %v1608_v50 = vpop.f32.mrb[1].mxu0  ;;  %v1610_v51 = vpop.f32.mrb[1].mxu1 }
 0x15f   :  { %v1612_v52 = vpop.f32.mrb[2].mxu0  ;;  %v1614_v53 = vpop.f32.mrb[2].mxu1  ;;  %v470_v54 = vadd.f32 %v1608_v50, %v1604_v48  ;;  %v494_v55 = vadd.f32 %v1610_v51, %v1606_v49 }
 0x160   :  { %v1620_v56 = vpop.f32.mrb[3].mxu0  ;;  %v1622_v57 = vpop.f32.mrb[3].mxu1 }
 0x161   :  { %471 = vadd.xlane.f32.xlu0 %v470_v54  ;;  %v497_v58 = vadd.f32 %v1622_v57, %v1614_v53  ;;  %v473_v59 = vadd.f32 %v1620_v56, %v1612_v52 }
 0x163   :  { %498 = vadd.xlane.f32.xlu1 %v497_v58 }
 0x165   :  { %495 = vadd.xlane.f32.xlu0 %v494_v55  ;;  %v1628_v60 = vpop.f32.mrb[4].mxu0  ;;  %v1630_v61 = vpop.f32.mrb[4].mxu1 }
 0x166   :  { %v1632_v62 = vpop.f32.mrb[5].mxu0  ;;  %v1634_v63 = vpop.f32.mrb[5].mxu1 }
 0x167   :  { %v1636_v0 = vpop.f32.mrb[6].mxu0  ;;  %v476_v1 = vadd.f32 %v1632_v62, %v1628_v60  ;;  %v1640_v2 = vpop.f32.mrb[6].mxu1  ;;  %v500_v3 = vadd.f32 %v1634_v63, %v1630_v61 }
 0x168   :  { %v1644_v4 = vpop.f32.mrb[7].mxu0  ;;  %v1646_v5 = vpop.f32.mrb[7].mxu1 }
 0x169   :  { %474 = vadd.xlane.f32.xlu0 %v473_v59  ;;  %477 = vadd.xlane.f32.xlu1 %v476_v1  ;;  %v479_v6 = vadd.f32 %v1644_v4, %v1636_v0  ;;  %v503_v7 = vadd.f32 %v1646_v5, %v1640_v2 }
 0x16d   :  { %501 = vadd.xlane.f32.xlu0 %v500_v3  ;;  %480 = vadd.xlane.f32.xlu1 %v479_v6  ;;  %v1652_v8 = vpop.f32.mrb[8].mxu0  ;;  %v1654_v9 = vpop.f32.mrb[8].mxu1 }
 0x16e   :  { %v1656_v10 = vpop.f32.mrb[9].mxu0  ;;  %v1658_v11 = vpop.f32.mrb[9].mxu1 }
 0x16f   :  { %v482_v12 = vadd.f32 %v1656_v10, %v1652_v8  ;;  %v1662_v13 = vpop.f32.mrb[10].mxu0  ;;  %v1664_v14 = vpop.f32.mrb[10].mxu1  ;;  %v506_v15 = vadd.f32 %v1658_v11, %v1654_v9 }
 0x170   :  { %v1668_v16 = vpop.f32.mrb[11].mxu0  ;;  %v1670_v17 = vpop.f32.mrb[11].mxu1 }
 0x171   :  { %504 = vadd.xlane.f32.xlu1 %v503_v7  ;;  %483 = vadd.xlane.f32.xlu0 %v482_v12  ;;  %v485_v18 = vadd.f32 %v1668_v16, %v1662_v13  ;;  %v509_v19 = vadd.f32 %v1670_v17, %v1664_v14 }
 0x175   :  { %507 = vadd.xlane.f32.xlu0 %v506_v15  ;;  %486 = vadd.xlane.f32.xlu1 %v485_v18  ;;  %v1676_v20 = vpop.f32.mrb[12].mxu0  ;;  %v1678_v21 = vpop.f32.mrb[12].mxu1 }
 0x176   :  { %v1680_v22 = vpop.f32.mrb[13].mxu0  ;;  %v1682_v23 = vpop.f32.mrb[13].mxu1 }
 0x177   :  { %v488_v24 = vadd.f32 %v1680_v22, %v1676_v20  ;;  %v1686_v25 = vpop.f32.mrb[14].mxu0  ;;  %v1688_v26 = vpop.f32.mrb[14].mxu1  ;;  %v512_v27 = vadd.f32 %v1682_v23, %v1678_v21 }
 0x178   :  { %v1692_v28 = vpop.f32.mrb[15].mxu0  ;;  %v1694_v29 = vpop.f32.mrb[15].mxu1 }
 0x179   :  { %510 = vadd.xlane.f32.xlu1 %v509_v19  ;;  %489 = vadd.xlane.f32.xlu0 %v488_v24  ;;  %v491_v30 = vadd.f32 %v1692_v28, %v1686_v25  ;;  %v515_v31 = vadd.f32 %v1694_v29, %v1688_v26 }
 0x17d   :  { %513 = vadd.xlane.f32.xlu0 %v512_v27  ;;  %492 = vadd.xlane.f32.xlu1 %v491_v30 }
 0x181   :  { %516 = vadd.xlane.f32.xlu1 %v515_v31 }
 0x1ee   :  { %v472_v32 = vpop.xlane.xlu0 %471 }
 0x1ef   :  { %v519_v33 = vmul.f32 0.00390625, %v472_v32 }
 0x1f0   :  { %v499_v36 = vpop.xlane.xlu1 %498 }
 0x1f1   :  { %v1701_v34 = vsub.f32 %v1604_v48, %v519_v33  ;;  %v1704_v35 = vsub.f32 %v1608_v50, %v519_v33  ;;  %v528_v43 = vmul.f32 0.00390625, %v499_v36 }
 0x1f2   :  { %v496_v37 = vpop.xlane.xlu0 %495 }
 0x1f3   :  { %v527_v38 = vmul.f32 0.00390625, %v496_v37  ;;  %v567_v39 = vmul.f32 %v1701_v34, %v1701_v34  ;;  %v568_v40 = vmul.f32 %v1704_v35, %v1704_v35  ;;  %v1733_v59 = vsub.f32 %v1614_v53, %v528_v43 }
 0x1f4   :  { %v1736_v1 = vsub.f32 %v1622_v57, %v528_v43 }
 0x1f5   :  { %v1711_v41 = vsub.f32 %v1606_v49, %v527_v38  ;;  %v1714_v42 = vsub.f32 %v1610_v51, %v527_v38  ;;  %v599_v46 = vadd.f32 %v568_v40, %v567_v39  ;;  %v585_v32 = vmul.f32 %v1733_v59, %v1733_v59 }
 0x1f6   :  { %v475_v44 = vpop.xlane.xlu0 %474  ;;  %v478_v45 = vpop.xlane.xlu1 %477 }
 0x1f7   :  { %v520_v47 = vmul.f32 0.00390625, %v475_v44  ;;  %v521_v48 = vmul.f32 0.00390625, %v478_v45  ;;  %v583_v50 = vmul.f32 %v1711_v41, %v1711_v41  ;;  %v584_v54 = vmul.f32 %v1714_v42, %v1714_v42  ;;  %600 = vadd.xlane.f32.xlu0 %v599_v46 }
 0x1f9   :  { %v1721_v55 = vsub.f32 %v1612_v52, %v520_v47  ;;  %v1724_v49 = vsub.f32 %v1620_v56, %v520_v47  ;;  %v1727_v51 = vsub.f32 %v1628_v60, %v521_v48  ;;  %v1730_v58 = vsub.f32 %v1632_v62, %v521_v48 }
 0x1fa   :  { %v502_v3 = vpop.xlane.xlu0 %501  ;;  %v481_v6 = vpop.xlane.xlu1 %480  ;;  %v623_v7 = vadd.f32 %v584_v54, %v583_v50 }
 0x1fb   :  { %v529_v52 = vmul.f32 0.00390625, %v502_v3  ;;  %v522_v12 = vmul.f32 0.00390625, %v481_v6  ;;  %v571_v56 = vmul.f32 %v1727_v51, %v1727_v51  ;;  %v572_v60 = vmul.f32 %v1730_v58, %v1730_v58 }
 0x1fc   :  { %624 = vadd.xlane.f32.xlu0 %v623_v7  ;;  %v569_v62 = vmul.f32 %v1721_v55, %v1721_v55  ;;  %v570_v53 = vmul.f32 %v1724_v49, %v1724_v49 }
 0x1fd   :  { %v1747_v57 = vsub.f32 %v1630_v61, %v529_v52  ;;  %v1750_v15 = vsub.f32 %v1634_v63, %v529_v52  ;;  %v1753_v18 = vsub.f32 %v1636_v0, %v522_v12  ;;  %v1756_v19 = vsub.f32 %v1644_v4, %v522_v12 }
 0x1fe   :  { %v505_v24 = vpop.xlane.xlu1 %504  ;;  %v484_v27 = vpop.xlane.xlu0 %483  ;;  %v605_v30 = vadd.f32 %v572_v60, %v571_v56  ;;  %v602_v31 = vadd.f32 %v570_v53, %v569_v62  ;;  %v586_v61 = vmul.f32 %v1736_v1, %v1736_v1 }
 0x1ff   :  { %v530_v33 = vmul.f32 0.00390625, %v505_v24  ;;  %v523_v36 = vmul.f32 0.00390625, %v484_v27  ;;  %v587_v63 = vmul.f32 %v1747_v57, %v1747_v57  ;;  %v588_v0 = vmul.f32 %v1750_v15, %v1750_v15 }
 0x200   :  { %606 = vadd.xlane.f32.xlu0 %v605_v30  ;;  %603 = vadd.xlane.f32.xlu1 %v602_v31  ;;  %v573_v4 = vmul.f32 %v1753_v18, %v1753_v18  ;;  %v574_v40 = vmul.f32 %v1756_v19, %v1756_v19  ;;  %v626_v47 = vadd.f32 %v586_v61, %v585_v32 }
 0x201   :  { %v1769_v37 = vsub.f32 %v1640_v2, %v530_v33  ;;  %v1772_v38 = vsub.f32 %v1652_v8, %v523_v36  ;;  %v1775_v39 = vsub.f32 %v1656_v10, %v523_v36  ;;  %v1780_v43 = vsub.f32 %v1646_v5, %v530_v33 }
 0x202   :  { %v508_v44 = vpop.xlane.xlu0 %507  ;;  %v487_v45 = vpop.xlane.xlu1 %486  ;;  %v629_v46 = vadd.f32 %v588_v0, %v587_v63  ;;  %v608_v54 = vadd.f32 %v574_v40, %v573_v4 }
 0x203   :  { %v531_v48 = vmul.f32 0.00390625, %v508_v44  ;;  %v524_v50 = vmul.f32 0.00390625, %v487_v45  ;;  %v575_v2 = vmul.f32 %v1772_v38, %v1772_v38  ;;  %v576_v8 = vmul.f32 %v1775_v39, %v1775_v39 }
 0x204   :  { %630 = vadd.xlane.f32.xlu0 %v629_v46  ;;  %627 = vadd.xlane.f32.xlu1 %v626_v47  ;;  %v589_v3 = vmul.f32 %v1769_v37, %v1769_v37 }
 0x205   :  { %v1787_v10 = vsub.f32 %v1654_v9, %v531_v48  ;;  %v1790_v5 = vsub.f32 %v1658_v11, %v531_v48  ;;  %v1795_v6 = vsub.f32 %v1662_v13, %v524_v50  ;;  %v1798_v7 = vsub.f32 %v1668_v16, %v524_v50 }
 0x206   :  { %v511_v52 = vpop.xlane.xlu1 %510  ;;  %v490_v12 = vpop.xlane.xlu0 %489  ;;  %v611_v56 = vadd.f32 %v576_v8, %v575_v2  ;;  %v590_v9 = vmul.f32 %v1780_v43, %v1780_v43 }
 0x207   :  { %v532_v60 = vmul.f32 0.00390625, %v511_v52  ;;  %v525_v62 = vmul.f32 0.00390625, %v490_v12  ;;  %v591_v11 = vmul.f32 %v1787_v10, %v1787_v10  ;;  %v592_v53 = vmul.f32 %v1790_v5, %v1790_v5 }
 0x208   :  { %612 = vadd.xlane.f32.xlu0 %v611_v56  ;;  %609 = vadd.xlane.f32.xlu1 %v608_v54  ;;  %v632_v61 = vadd.f32 %v590_v9, %v589_v3  ;;  %v577_v33 = vmul.f32 %v1795_v6, %v1795_v6 }
 0x209   :  { %v1807_v13 = vsub.f32 %v1664_v14, %v532_v60  ;;  %v1810_v16 = vsub.f32 %v1670_v17, %v532_v60  ;;  %v1813_v24 = vsub.f32 %v1676_v20, %v525_v62  ;;  %v1816_v27 = vsub.f32 %v1680_v22, %v525_v62 }
 0x20a   :  { %v514_v30 = vpop.xlane.xlu0 %513  ;;  %v493_v31 = vpop.xlane.xlu1 %492  ;;  %v635_v32 = vadd.f32 %v592_v53, %v591_v11  ;;  %v578_v14 = vmul.f32 %v1798_v7, %v1798_v7  ;;  %v729_v60 = vlaneseq }
 0x20b   :  { %v533_v36 = vmul.f32 0.00390625, %v514_v30  ;;  %v526_v63 = vmul.f32 0.00390625, %v493_v31  ;;  %v579_v17 = vmul.f32 %v1813_v24, %v1813_v24  ;;  %v580_v20 = vmul.f32 %v1816_v27, %v1816_v27 }
 0x20c   :  { %636 = vadd.xlane.f32.xlu0 %v635_v32  ;;  %633 = vadd.xlane.f32.xlu1 %v632_v61  ;;  %v593_v4 = vmul.f32 %v1807_v13, %v1807_v13  ;;  %v594_v40 = vmul.f32 %v1810_v16, %v1810_v16  ;;  %v614_v48 = vadd.f32 %v578_v14, %v577_v33  ;;  %v730_v30 = vshrl.u32 %v729_v60, 7 }
 0x20d   :  { %v1827_v22 = vsub.f32 %v1678_v21, %v533_v36  ;;  %v1830_v0 = vsub.f32 %v1682_v23, %v533_v36  ;;  %v1837_v44 = vsub.f32 %v1686_v25, %v526_v63  ;;  %v1840_v45 = vsub.f32 %v1692_v28, %v526_v63 }
 0x20e   :  { %v517_v46 = vpop.xlane.xlu1 %516  ;;  %v617_v47 = vadd.f32 %v580_v20, %v579_v17  ;;  %v638_v8 = vadd.f32 %v594_v40, %v593_v4  ;;  %v731_v36 = vsub.s32 0, %v730_v30  ;;  %v735_v63 = vsub.s32 1, %v730_v30  ;;  %v727_v17 = vld [vmem:[#allocation7] sm:$0x3] }
 0x20f   :  { %v534_v21 = vmul.f32 0.00390625, %v517_v46  ;;  %v595_v23 = vmul.f32 %v1827_v22, %v1827_v22  ;;  %v596_v50 = vmul.f32 %v1830_v0, %v1830_v0  ;;  %v581_v54 = vmul.f32 %v1837_v44, %v1837_v44 }
 0x210   :  { %618 = vadd.xlane.f32.xlu0 %v617_v47  ;;  %615 = vadd.xlane.f32.xlu1 %v614_v48  ;;  %v582_v3 = vmul.f32 %v1840_v45, %v1840_v45  ;;  %v771_v47 = vld [vmem:[#allocation8] sm:$0x3] }
 0x211   :  { %v641_v2 = vadd.f32 %v596_v50, %v595_v23  ;;  %v1847_v25 = vsub.f32 %v1688_v26, %v534_v21  ;;  %v1850_v28 = vsub.f32 %v1694_v29, %v534_v21  ;;  %v1860_v23 = vrot.slane %v727_v17, %v731_v36 }
 0x212   :  { %v620_v52 = vadd.f32 %v582_v3, %v581_v54  ;;  %v1862_v50 = vrot.slane %v727_v17, %v735_v63  ;;  %v1864_v3 = vrot.slane %v771_v47, %v731_v36 }
 0x213   :  { %v597_v12 = vmul.f32 %v1847_v25, %v1847_v25  ;;  %v598_v56 = vmul.f32 %v1850_v28, %v1850_v28 }
 0x214   :  { %642 = vadd.xlane.f32.xlu0 %v641_v2  ;;  %639 = vadd.xlane.f32.xlu1 %v638_v8 }
 0x215   :  { %v644_v26 = vadd.f32 %v598_v56, %v597_v12 }
 0x218   :  { %621 = vadd.xlane.f32.xlu1 %v620_v52  ;;  %v1866_v52 = vrot.slane %v771_v47, %v735_v63 }
 0x21c   :  { %645 = vadd.xlane.f32.xlu1 %v644_v26 }
 0x284   :  { %v601_v29 = vpop.xlane.xlu0 %600 }
 0x285   :  { %v647_v9 = vmul.f32 0.00390625, %v601_v29 }
 0x287   :  { %v663_v62 = vadd.f32 1e-05, %v647_v9 }
 0x289   :  { %v625_v11 = vpop.xlane.xlu0 %624  ;;  %1297 = vrsqrt.f32 %v663_v62 }
 0x28a   :  { %v655_v53 = vmul.f32 0.00390625, %v625_v11 }
 0x28c   :  { %v671_v31 = vadd.f32 1e-05, %v655_v53 }
 0x28d   :  { %v607_v32 = vpop.xlane.xlu0 %606  ;;  %v604_v61 = vpop.xlane.xlu1 %603 }
 0x28e   :  { %1299 = vrsqrt.f32 %v671_v31  ;;  %v649_v33 = vmul.f32 0.00390625, %v607_v32  ;;  %v648_v14 = vmul.f32 0.00390625, %v604_v61 }
 0x290   :  { %v665_v20 = vadd.f32 1e-05, %v649_v33  ;;  %v664_v4 = vadd.f32 1e-05, %v648_v14 }
 0x291   :  { %v631_v40 = vpop.xlane.xlu0 %630  ;;  %v628_v46 = vpop.xlane.xlu1 %627 }
 0x292   :  { %1301 = vrsqrt.f32 %v665_v20  ;;  %v657_v48 = vmul.f32 0.00390625, %v631_v40  ;;  %v656_v21 = vmul.f32 0.00390625, %v628_v46 }
 0x293   :  { %1303 = vrsqrt.f32 %v664_v4  ;;  %v1298_v2 = vpop.eup %1297 }
 0x294   :  { %v673_v8 = vadd.f32 1e-05, %v657_v48  ;;  %v672_v54 = vadd.f32 1e-05, %v656_v21  ;;  %v695_v12 = vmul.f32 %v1298_v2, %v1701_v34  ;;  %v696_v56 = vmul.f32 %v1298_v2, %v1704_v35 }
 0x295   :  { %v613_v26 = vpop.xlane.xlu0 %612  ;;  %v610_v29 = vpop.xlane.xlu1 %609 }
 0x296   :  { %1305 = vrsqrt.f32 %v673_v8  ;;  %v651_v9 = vmul.f32 0.00390625, %v613_v26  ;;  %v739_v60 = vmul.f32 %v1860_v23, %v695_v12  ;;  %v740_v62 = vmul.f32 %v1862_v50, %v696_v56 }
 0x297   :  { %1307 = vrsqrt.f32 %v672_v54  ;;  %v650_v11 = vmul.f32 0.00390625, %v610_v29 }
 0x298   :  { %v1300_v53 = vpop.eup %1299  ;;  %v667_v30 = vadd.f32 1e-05, %v651_v9  ;;  %v783_v31 = vadd.f32 %v1864_v3, %v739_v60  ;;  %v784_v32 = vadd.f32 %v1866_v52, %v740_v62 }
 0x299   :  { %v711_v34 = vmul.f32 %v1300_v53, %v1711_v41  ;;  %v712_v35 = vmul.f32 %v1300_v53, %v1714_v42  ;;  %v637_v61 = vpop.xlane.xlu0 %636  ;;  %v634_v14 = vpop.xlane.xlu1 %633  ;;  %v666_v17 = vadd.f32 1e-05, %v650_v11 }
 0x29a   :  { %v659_v33 = vmul.f32 0.00390625, %v637_v61  ;;  %v847_v36 = vmul.f32 0.70710677, %v783_v31  ;;  %v848_v63 = vmul.f32 0.70710677, %v784_v32  ;;  %1309 = vrsqrt.f32 %v667_v30 }
 0x29b   :  { %v755_v4 = vmul.f32 %v1860_v23, %v711_v34  ;;  %v756_v40 = vmul.f32 %v1862_v50, %v712_v35  ;;  %v658_v42 = vmul.f32 0.00390625, %v634_v14  ;;  %v815_v29 = vmul.f32 0.5, %v783_v31 }
 0x29c   :  { %v1302_v20 = vpop.eup %1301  ;;  %v675_v46 = vadd.f32 1e-05, %v659_v33  ;;  %1311 = verf.f32 %v847_v36  ;;  %v816_v31 = vmul.f32 0.5, %v784_v32 }
 0x29d   :  { %v1304_v47 = vpop.eup %1303  ;;  %v699_v48 = vmul.f32 %v1302_v20, %v1727_v51  ;;  %v700_v41 = vmul.f32 %v1302_v20, %v1730_v58  ;;  %1313 = verf.f32 %v848_v63  ;;  %v799_v21 = vadd.f32 %v1864_v3, %v755_v4 }
 0x29e   :  { %v800_v2 = vadd.f32 %v1866_v52, %v756_v40  ;;  %v697_v8 = vmul.f32 %v1304_v47, %v1721_v55  ;;  %v698_v56 = vmul.f32 %v1304_v47, %v1724_v49  ;;  %1315 = vrsqrt.f32 %v666_v17 }
 0x29f   :  { %v743_v54 = vmul.f32 %v1860_v23, %v699_v48  ;;  %v744_v12 = vmul.f32 %v1862_v50, %v700_v41  ;;  %v863_v51 = vmul.f32 0.70710677, %v799_v21  ;;  %1317 = vrsqrt.f32 %v675_v46 }
 0x2a0   :  { %v1306_v26 = vpop.eup %1305  ;;  %v864_v9 = vmul.f32 0.70710677, %v800_v2  ;;  %v741_v11 = vmul.f32 %v1860_v23, %v697_v8  ;;  %v742_v55 = vmul.f32 %v1862_v50, %v698_v56  ;;  %v1893_v35 = vadd.f32 1e-05, %v658_v42 }
 0x2a1   :  { %v1308_v58 = vpop.eup %1307  ;;  %v787_v60 = vadd.f32 %v1864_v3, %v743_v54  ;;  %v788_v62 = vadd.f32 %v1866_v52, %v744_v12  ;;  %1319 = verf.f32 %v863_v51  ;;  %v715_v53 = vmul.f32 %v1306_v26, %v1747_v57 }
 0x2a2   :  { %v716_v49 = vmul.f32 %v1306_v26, %v1750_v15  ;;  %v713_v30 = vmul.f32 %v1308_v58, %v1733_v59  ;;  %1321 = verf.f32 %v864_v9  ;;  %v785_v33 = vadd.f32 %v1864_v3, %v741_v11 }
 0x2a3   :  { %v851_v34 = vmul.f32 0.70710677, %v787_v60  ;;  %v852_v61 = vmul.f32 0.70710677, %v788_v62  ;;  %v786_v14 = vadd.f32 %v1866_v52, %v742_v55  ;;  %v759_v36 = vmul.f32 %v1860_v23, %v715_v53 }
 0x2a4   :  { %v1310_v63 = vpop.eup %1309  ;;  %v760_v57 = vmul.f32 %v1862_v50, %v716_v49  ;;  %v714_v15 = vmul.f32 %v1308_v58, %v1736_v1  ;;  %v757_v59 = vmul.f32 %v1860_v23, %v713_v30  ;;  %v831_v32 = vmul.f32 0.5, %v799_v21 }
 0x2a5   :  { %1323 = verf.f32 %v851_v34  ;;  %v832_v17 = vmul.f32 0.5, %v800_v2  ;;  %v849_v20 = vmul.f32 0.70710677, %v785_v33  ;;  %v850_v40 = vmul.f32 0.70710677, %v786_v14 }
 0x2a6   :  { %1325 = verf.f32 %v852_v61  ;;  %v1312_v4 = vpop.eup %1311  ;;  %v803_v46 = vadd.f32 %v1864_v3, %v759_v36  ;;  %v804_v47 = vadd.f32 %v1866_v52, %v760_v57  ;;  %v758_v48 = vmul.f32 %v1862_v50, %v714_v15  ;;  %v1913_v57 = vpop.xlane.xlu1 %615 }
 0x2a7   :  { %v1314_v41 = vpop.eup %1313  ;;  %v911_v42 = vadd.f32 1.0, %v1312_v4  ;;  %1327 = verf.f32 %v849_v20  ;;  %v1905_v8 = vadd.f32 %v1864_v3, %v757_v59  ;;  %v703_v1 = vmul.f32 %v1310_v63, %v1772_v38 }
 0x2a8   :  { %v1316_v21 = vpop.eup %1315  ;;  %v912_v2 = vadd.f32 1.0, %v1314_v41  ;;  %v819_v54 = vmul.f32 0.5, %v787_v60  ;;  %v820_v12 = vmul.f32 0.5, %v788_v62  ;;  %1329 = verf.f32 %v850_v40 }
 0x2a9   :  { %v1318_v56 = vpop.eup %1317  ;;  %v943_v26 = vmul.f32 %v911_v42, %v815_v29  ;;  %v867_v51 = vmul.f32 0.70710677, %v803_v46  ;;  %v868_v9 = vmul.f32 0.70710677, %v804_v47  ;;  %v802_v58 = vadd.f32 %v1866_v52, %v758_v48 }
 0x2aa   :  { %v944_v11 = vmul.f32 %v912_v2, %v816_v31  ;;  %v817_v55 = vmul.f32 0.5, %v785_v33  ;;  %v865_v53 = vmul.f32 0.70710677, %v1905_v8  ;;  %v704_v49 = vmul.f32 %v1310_v63, %v1775_v39 }
 0x2ab   :  { %v1320_v30 = vpop.eup %1319  ;;  %v818_v34 = vmul.f32 0.5, %v786_v14  ;;  %1331 = verf.f32 %v867_v51  ;;  %v866_v38 = vmul.f32 0.70710677, %v802_v58  ;;  %v747_v60 = vmul.f32 %v1860_v23, %v703_v1 }
 0x2ac   :  { %v1322_v62 = vpop.eup %1321  ;;  %v1170_v61 = vpack.c.bf16 %v944_v11, %v943_v26  ;;  %v927_v36 = vadd.f32 1.0, %v1320_v30  ;;  %1333 = verf.f32 %v868_v9  ;;  %v748_v29 = vmul.f32 %v1862_v50, %v704_v49  ;;  %v619_v30 = vpop.xlane.xlu0 %618 }
 0x2ad   :  { %v928_v31 = vadd.f32 1.0, %v1322_v62  ;;  %1335 = verf.f32 %v865_v53  ;;  %v791_v33 = vadd.f32 %v1864_v3, %v747_v60  ;;  %v701_v39 = vmul.f32 %v1316_v21, %v1753_v18 }
 0x2ae   :  { %1071 = vst [vmem:[#allocation10] sm:$0xff] %v1170_v61  ;;  %v959_v14 = vmul.f32 %v927_v36, %v831_v32  ;;  %1337 = verf.f32 %v866_v38  ;;  %v792_v15 = vadd.f32 %v1866_v52, %v748_v29  ;;  %v702_v59 = vmul.f32 %v1316_v21, %v1756_v19 }
 0x2af   :  { %v1324_v63 = vpop.eup %1323  ;;  %v960_v4 = vmul.f32 %v928_v31, %v832_v17  ;;  %v835_v48 = vmul.f32 0.5, %v803_v46  ;;  %v855_v41 = vmul.f32 0.70710677, %v791_v33  ;;  %v836_v1 = vmul.f32 0.5, %v804_v47  ;;  %v640_v17 = vpop.xlane.xlu1 %639 }
 0x2b0   :  { %v1326_v20 = vpop.eup %1325  ;;  %v915_v40 = vadd.f32 1.0, %v1324_v63  ;;  %v856_v2 = vmul.f32 0.70710677, %v792_v15  ;;  %v745_v26 = vmul.f32 %v1860_v23, %v701_v39  ;;  %v746_v32 = vmul.f32 %v1862_v50, %v702_v59 }
 0x2b1   :  { %v916_v42 = vadd.f32 1.0, %v1326_v20  ;;  %v1328_v51 = vpop.eup %1327  ;;  %v1178_v18 = vpack.c.bf16 %v960_v4, %v959_v14  ;;  %1339 = verf.f32 %v855_v41  ;;  %v719_v21 = vmul.f32 %v1318_v56, %v1787_v10 }
 0x2b2   :  { %v947_v9 = vmul.f32 %v915_v40, %v819_v54  ;;  %v1330_v11 = vpop.eup %1329  ;;  %v913_v49 = vadd.f32 1.0, %v1328_v51  ;;  %1341 = verf.f32 %v856_v2  ;;  %v1922_v19 = vadd.f32 %v1864_v3, %v745_v26  ;;  %v643_v51 = vpop.xlane.xlu0 %642 }
 0x2b3   :  { %v948_v53 = vmul.f32 %v916_v42, %v820_v12  ;;  %1079 = vst [vmem:[#allocation10 + $0x40] sm:$0xff] %v1178_v18  ;;  %v914_v46 = vadd.f32 1.0, %v1330_v11  ;;  %v1925_v47 = vadd.f32 %v1866_v52, %v746_v32  ;;  %v720_v54 = vmul.f32 %v1318_v56, %v1790_v5  ;;  %v622_v40 = vpop.xlane.xlu1 %621 }
 0x2b4   :  { %v945_v60 = vmul.f32 %v913_v49, %v817_v55  ;;  %v833_v12 = vmul.f32 0.5, %v1905_v8  ;;  %v853_v62 = vmul.f32 0.70710677, %v1922_v19  ;;  %v834_v29 = vmul.f32 0.5, %v802_v58 }
 0x2b5   :  { %v1172_v38 = vpack.c.bf16 %v948_v53, %v947_v9  ;;  %v1332_v61 = vpop.eup %1331  ;;  %v946_v36 = vmul.f32 %v914_v46, %v818_v34  ;;  %v854_v31 = vmul.f32 0.70710677, %v1925_v47  ;;  %v763_v39 = vmul.f32 %v1860_v23, %v719_v21 }
 0x2b6   :  { %v1334_v63 = vpop.eup %1333  ;;  %v931_v14 = vadd.f32 1.0, %v1332_v61  ;;  %1343 = verf.f32 %v853_v62  ;;  %v764_v10 = vmul.f32 %v1862_v50, %v720_v54  ;;  %v653_v5 = vmul.f32 0.00390625, %v619_v30 }
 0x2b7   :  { %1073 = vst [vmem:[#allocation10 + $0x10] sm:$0xff] %v1172_v38  ;;  %v1336_v56 = vpop.eup %1335  ;;  %v1171_v55 = vpack.c.bf16 %v946_v36, %v945_v60  ;;  %v932_v59 = vadd.f32 1.0, %v1334_v63  ;;  %1345 = verf.f32 %v854_v31  ;;  %v1935_v8 = vadd.f32 %v1864_v3, %v763_v39  ;;  %v646_v61 = vpop.xlane.xlu1 %645 }
 0x2b8   :  { %v1338_v34 = vpop.eup %1337  ;;  %v963_v58 = vmul.f32 %v931_v14, %v835_v48  ;;  %v929_v20 = vadd.f32 1.0, %v1336_v56  ;;  %v808_v4 = vadd.f32 %v1866_v52, %v764_v10  ;;  %1347 = vrsqrt.f32 %v1893_v35 }
 0x2b9   :  { %1072 = vst [vmem:[#allocation10 + $0x8] sm:$0xff] %v1171_v55  ;;  %v964_v41 = vmul.f32 %v932_v59, %v836_v1  ;;  %v930_v42 = vadd.f32 1.0, %v1338_v34  ;;  %v823_v2 = vmul.f32 0.5, %v791_v33  ;;  %v871_v26 = vmul.f32 0.70710677, %v1935_v8 }
 0x2ba   :  { %v961_v18 = vmul.f32 %v929_v20, %v833_v12  ;;  %v824_v9 = vmul.f32 0.5, %v792_v15  ;;  %v872_v32 = vmul.f32 0.70710677, %v808_v4  ;;  %v669_v11 = vadd.f32 1e-05, %v653_v5 }
 0x2bb   :  { %v1340_v53 = vpop.eup %1339  ;;  %v1180_v49 = vpack.c.bf16 %v964_v41, %v963_v58  ;;  %v962_v48 = vmul.f32 %v930_v42, %v834_v29  ;;  %1349 = verf.f32 %v871_v26  ;;  %v652_v46 = vmul.f32 0.00390625, %v1913_v57 }
 0x2bc   :  { %v1342_v21 = vpop.eup %1341  ;;  %v919_v35 = vadd.f32 1.0, %v1340_v53  ;;  %1351 = verf.f32 %v872_v32  ;;  %v661_v54 = vmul.f32 0.00390625, %v643_v51  ;;  %v660_v1 = vmul.f32 0.00390625, %v640_v17 }
 0x2bd   :  { %1081 = vst [vmem:[#allocation10 + $0x50] sm:$0xff] %v1180_v49  ;;  %v1179_v33 = vpack.c.bf16 %v962_v48, %v961_v18  ;;  %v920_v30 = vadd.f32 1.0, %v1342_v21  ;;  %1353 = vrsqrt.f32 %v669_v11  ;;  %v668_v38 = vadd.f32 1e-05, %v652_v46 }
 0x2be   :  { %v951_v60 = vmul.f32 %v919_v35, %v823_v2  ;;  %v677_v15 = vadd.f32 1e-05, %v661_v54  ;;  %v676_v12 = vadd.f32 1e-05, %v660_v1  ;;  %v654_v62 = vmul.f32 0.00390625, %v622_v40 }
 0x2bf   :  { %1080 = vst [vmem:[#allocation10 + $0x48] sm:$0xff] %v1179_v33  ;;  %v952_v36 = vmul.f32 %v920_v30, %v824_v9  ;;  %1355 = vrsqrt.f32 %v668_v38  ;;  %v821_v57 = vmul.f32 0.5, %v1922_v19  ;;  %v662_v14 = vmul.f32 0.00390625, %v646_v61 }
 0x2c0   :  { %v1344_v29 = vpop.eup %1343  ;;  %1357 = vrsqrt.f32 %v677_v15  ;;  %v670_v31 = vadd.f32 1e-05, %v654_v62  ;;  %v822_v5 = vmul.f32 0.5, %v1925_v47  ;;  %v839_v26 = vmul.f32 0.5, %v1935_v8 }
 0x2c1   :  { %v1346_v39 = vpop.eup %1345  ;;  %v1174_v17 = vpack.c.bf16 %v952_v36, %v951_v60  ;;  %v917_v63 = vadd.f32 1.0, %v1344_v29  ;;  %1359 = vrsqrt.f32 %v676_v12  ;;  %v678_v41 = vadd.f32 1e-05, %v662_v14 }
 0x2c2   :  { %v1348_v10 = vpop.eup %1347  ;;  %v918_v56 = vadd.f32 1.0, %v1346_v39  ;;  %1361 = vrsqrt.f32 %v670_v31  ;;  %v840_v18 = vmul.f32 0.5, %v808_v4 }
 0x2c3   :  { %1075 = vst [vmem:[#allocation10 + $0x20] sm:$0xff] %v1174_v17  ;;  %v949_v55 = vmul.f32 %v917_v63, %v821_v57  ;;  %v717_v59 = vmul.f32 %v1348_v10, %v1769_v37  ;;  %v718_v34 = vmul.f32 %v1348_v10, %v1780_v43  ;;  %1363 = vrsqrt.f32 %v678_v41 }
 0x2c4   :  { %v950_v58 = vmul.f32 %v918_v56, %v822_v5 }
 0x2c5   :  { %v1350_v19 = vpop.eup %1349  ;;  %v761_v20 = vmul.f32 %v1860_v23, %v717_v59  ;;  %v762_v40 = vmul.f32 %v1862_v50, %v718_v34 }
 0x2c6   :  { %v1352_v42 = vpop.eup %1351  ;;  %v1173_v2 = vpack.c.bf16 %v950_v58, %v949_v55  ;;  %v935_v47 = vadd.f32 1.0, %v1350_v19 }
 0x2c7   :  { %v1354_v51 = vpop.eup %1353  ;;  %v936_v9 = vadd.f32 1.0, %v1352_v42  ;;  %v805_v37 = vadd.f32 %v1864_v3, %v761_v20  ;;  %v806_v43 = vadd.f32 %v1866_v52, %v762_v40 }
 0x2c8   :  { %1074 = vst [vmem:[#allocation10 + $0x18] sm:$0xff] %v1173_v2  ;;  %v967_v32 = vmul.f32 %v935_v47, %v839_v26  ;;  %v707_v11 = vmul.f32 %v1354_v51, %v1813_v24  ;;  %v708_v53 = vmul.f32 %v1354_v51, %v1816_v27 }
 0x2c9   :  { %v1356_v49 = vpop.eup %1355  ;;  %v968_v48 = vmul.f32 %v936_v9, %v840_v18  ;;  %v869_v46 = vmul.f32 0.70710677, %v805_v37  ;;  %v870_v8 = vmul.f32 0.70710677, %v806_v43  ;;  %v837_v58 = vmul.f32 0.5, %v805_v37 }
 0x2ca   :  { %v1358_v21 = vpop.eup %1357  ;;  %v751_v35 = vmul.f32 %v1860_v23, %v707_v11  ;;  %v752_v4 = vmul.f32 %v1862_v50, %v708_v53  ;;  %v705_v54 = vmul.f32 %v1356_v49, %v1795_v6  ;;  %v706_v30 = vmul.f32 %v1356_v49, %v1798_v7 }
 0x2cb   :  { %v1360_v1 = vpop.eup %1359  ;;  %v1182_v33 = vpack.c.bf16 %v968_v48, %v967_v32  ;;  %1365 = verf.f32 %v869_v46  ;;  %v723_v24 = vmul.f32 %v1358_v21, %v1827_v22  ;;  %v724_v6 = vmul.f32 %v1358_v21, %v1830_v0 }
 0x2cc   :  { %1367 = verf.f32 %v870_v8  ;;  %v795_v27 = vadd.f32 %v1864_v3, %v751_v35  ;;  %v796_v38 = vadd.f32 %v1866_v52, %v752_v4  ;;  %v749_v60 = vmul.f32 %v1860_v23, %v705_v54  ;;  %v1362_v15 = vpop.eup %1361 }
 0x2cd   :  { %1083 = vst [vmem:[#allocation10 + $0x60] sm:$0xff] %v1182_v33  ;;  %v750_v12 = vmul.f32 %v1862_v50, %v706_v30  ;;  %v767_v62 = vmul.f32 %v1860_v23, %v723_v24  ;;  %v721_v61 = vmul.f32 %v1360_v1, %v1807_v13  ;;  %v768_v57 = vmul.f32 %v1862_v50, %v724_v6  ;;  %v1364_v5 = vpop.eup %1363 }
 0x2ce   :  { %v859_v7 = vmul.f32 0.70710677, %v795_v27  ;;  %v860_v36 = vmul.f32 0.70710677, %v796_v38  ;;  %v793_v22 = vadd.f32 %v1864_v3, %v749_v60  ;;  %v722_v39 = vmul.f32 %v1360_v1, %v1810_v16 }
 0x2cf   :  { %v794_v29 = vadd.f32 %v1866_v52, %v750_v12  ;;  %v811_v31 = vadd.f32 %v1864_v3, %v767_v62  ;;  %v765_v17 = vmul.f32 %v1860_v23, %v721_v61  ;;  %v709_v0 = vmul.f32 %v1362_v15, %v1837_v44 }
 0x2d0   :  { %1369 = verf.f32 %v859_v7  ;;  %v857_v63 = vmul.f32 0.70710677, %v793_v22  ;;  %v1972_v14 = vadd.f32 %v1866_v52, %v768_v57  ;;  %v766_v56 = vmul.f32 %v1862_v50, %v722_v39 }
 0x2d1   :  { %1371 = verf.f32 %v860_v36  ;;  %v858_v13 = vmul.f32 0.70710677, %v794_v29  ;;  %v875_v10 = vmul.f32 0.70710677, %v811_v31  ;;  %v1976_v55 = vadd.f32 %v1864_v3, %v765_v17 }
 0x2d2   :  { %1373 = verf.f32 %v857_v63  ;;  %v710_v16 = vmul.f32 %v1362_v15, %v1840_v45  ;;  %v876_v59 = vmul.f32 0.70710677, %v1972_v14  ;;  %v753_v44 = vmul.f32 %v1860_v23, %v709_v0 }
 0x2d3   :  { %1375 = verf.f32 %v858_v13  ;;  %v810_v19 = vadd.f32 %v1866_v52, %v766_v56  ;;  %v873_v20 = vmul.f32 0.70710677, %v1976_v55  ;;  %v838_v45 = vmul.f32 0.5, %v806_v43 }
 0x2d4   :  { %1377 = verf.f32 %v875_v10  ;;  %v754_v42 = vmul.f32 %v1862_v50, %v710_v16  ;;  %v797_v2 = vadd.f32 %v1864_v3, %v753_v44  ;;  %v725_v32 = vmul.f32 %v1364_v5, %v1847_v25 }
 0x2d5   :  { %v1366_v34 = vpop.eup %1365  ;;  %1379 = verf.f32 %v876_v59  ;;  %v874_v47 = vmul.f32 0.70710677, %v810_v19  ;;  %v726_v11 = vmul.f32 %v1364_v5, %v1850_v28  ;;  %v827_v49 = vmul.f32 0.5, %v795_v27 }
 0x2d6   :  { %v1368_v40 = vpop.eup %1367  ;;  %v933_v41 = vadd.f32 1.0, %v1366_v34  ;;  %1381 = verf.f32 %v873_v20  ;;  %v798_v18 = vadd.f32 %v1866_v52, %v754_v42  ;;  %v861_v9 = vmul.f32 0.70710677, %v797_v2 }
 0x2d7   :  { %v934_v26 = vadd.f32 1.0, %v1368_v40  ;;  %1383 = verf.f32 %v874_v47  ;;  %v769_v8 = vmul.f32 %v1860_v23, %v725_v32  ;;  %v770_v35 = vmul.f32 %v1862_v50, %v726_v11 }
 0x2d8   :  { %v965_v51 = vmul.f32 %v933_v41, %v837_v58  ;;  %v862_v48 = vmul.f32 0.70710677, %v798_v18  ;;  %1385 = verf.f32 %v861_v9  ;;  %v828_v4 = vmul.f32 0.5, %v796_v38 }
 0x2d9   :  { %v966_v37 = vmul.f32 %v934_v26, %v838_v45  ;;  %v813_v25 = vadd.f32 %v1864_v3, %v769_v8  ;;  %v814_v28 = vadd.f32 %v1866_v52, %v770_v35  ;;  %v825_v27 = vmul.f32 0.5, %v793_v22 }
 0x2da   :  { %v1370_v53 = vpop.eup %1369  ;;  %1387 = verf.f32 %v862_v48  ;;  %v826_v12 = vmul.f32 0.5, %v794_v29  ;;  %v843_v23 = vmul.f32 0.5, %v811_v31  ;;  %v844_v3 = vmul.f32 0.5, %v1972_v14 }
 0x2db   :  { %v1372_v46 = vpop.eup %1371  ;;  %v1181_v21 = vpack.c.bf16 %v966_v37, %v965_v51  ;;  %v923_v43 = vadd.f32 1.0, %v1370_v53  ;;  %v877_v62 = vmul.f32 0.70710677, %v813_v25  ;;  %v878_v36 = vmul.f32 0.70710677, %v814_v28 }
 0x2dc   :  { %v924_v54 = vadd.f32 1.0, %v1372_v46  ;;  %v1374_v1 = vpop.eup %1373  ;;  %v841_v22 = vmul.f32 0.5, %v1976_v55  ;;  %v842_v10 = vmul.f32 0.5, %v810_v19  ;;  %v829_v59 = vmul.f32 0.5, %v797_v2 }
 0x2dd   :  { %1082 = vst [vmem:[#allocation10 + $0x58] sm:$0xff] %v1181_v21  ;;  %v955_v33 = vmul.f32 %v923_v43, %v827_v49  ;;  %v1376_v30 = vpop.eup %1375  ;;  %v921_v60 = vadd.f32 1.0, %v1374_v1  ;;  %1389 = verf.f32 %v877_v62  ;;  %v830_v58 = vmul.f32 0.5, %v798_v18 }
 0x2de   :  { %v956_v24 = vmul.f32 %v924_v54, %v828_v4  ;;  %v1378_v15 = vpop.eup %1377  ;;  %v922_v6 = vadd.f32 1.0, %v1376_v30  ;;  %1391 = verf.f32 %v878_v36  ;;  %v845_v47 = vmul.f32 0.5, %v813_v25 }
 0x2df   :  { %v1380_v50 = vpop.eup %1379  ;;  %v953_v61 = vmul.f32 %v921_v60, %v825_v27  ;;  %v939_v7 = vadd.f32 1.0, %v1378_v15  ;;  %v846_v51 = vmul.f32 0.5, %v814_v28 }
 0x2e0   :  { %v1176_v38 = vpack.c.bf16 %v956_v24, %v955_v33  ;;  %v1382_v57 = vpop.eup %1381  ;;  %v954_v39 = vmul.f32 %v922_v6, %v826_v12  ;;  %v940_v17 = vadd.f32 1.0, %v1380_v50 }
 0x2e1   :  { %v971_v52 = vmul.f32 %v939_v7, %v843_v23  ;;  %v937_v0 = vadd.f32 1.0, %v1382_v57  ;;  %v1384_v29 = vpop.eup %1383 }
 0x2e2   :  { %1077 = vst [vmem:[#allocation10 + $0x30] sm:$0xff] %v1176_v38  ;;  %v1175_v31 = vpack.c.bf16 %v954_v39, %v953_v61  ;;  %v972_v63 = vmul.f32 %v940_v17, %v844_v3  ;;  %v1386_v13 = vpop.eup %1385  ;;  %v938_v5 = vadd.f32 1.0, %v1384_v29 }
 0x2e3   :  { %v969_v56 = vmul.f32 %v937_v0, %v841_v22  ;;  %v925_v44 = vadd.f32 1.0, %v1386_v13 }
 0x2e4   :  { %1076 = vst [vmem:[#allocation10 + $0x28] sm:$0xff] %v1175_v31  ;;  %v1184_v16 = vpack.c.bf16 %v972_v63, %v971_v52  ;;  %v1388_v14 = vpop.eup %1387  ;;  %v970_v34 = vmul.f32 %v938_v5, %v842_v10 }
 0x2e5   :  { %v926_v20 = vadd.f32 1.0, %v1388_v14  ;;  %v957_v40 = vmul.f32 %v925_v44, %v829_v59 }
 0x2e6   :  { %1085 = vst [vmem:[#allocation10 + $0x70] sm:$0xff] %v1184_v16  ;;  %v1183_v55 = vpack.c.bf16 %v970_v34, %v969_v56 }
 0x2e7   :  { %v958_v41 = vmul.f32 %v926_v20, %v830_v58  ;;  %v1390_v42 = vpop.eup %1389 }
 0x2e8   :  { %1084 = vst [vmem:[#allocation10 + $0x68] sm:$0xff] %v1183_v55  ;;  %v1392_v26 = vpop.eup %1391  ;;  %v941_v19 = vadd.f32 1.0, %v1390_v42 }
 0x2e9   :  { %v1177_v45 = vpack.c.bf16 %v958_v41, %v957_v40  ;;  %v942_v9 = vadd.f32 1.0, %v1392_v26 }
 0x2ea   :  { %v973_v37 = vmul.f32 %v941_v19, %v845_v47 }
 0x2eb   :  { %1078 = vst [vmem:[#allocation10 + $0x38] sm:$0xff] %v1177_v45  ;;  %v974_v2 = vmul.f32 %v942_v9, %v846_v51 }
 0x2ed   :  { %v1185_v32 = vpack.c.bf16 %v974_v2, %v973_v37 }
 0x2ef   :  { %1086 = vst [vmem:[#allocation10 + $0x78] sm:$0xff] %v1185_v32 }
 0x2f0   :  { %1492 = shalt.err (!%p1489_p8)
}
 0x2f1   :  { %s1493_s15 = scalar_lea.hbm %s2013_s4, 2048 }
 0x2f2   :  { %p1494_p9 = scmp.ne.s32.totalorder %s2013_s4, %s1493_s15  ;;  %p1497_p10 = scmp.lt.u32.totalorder %s1493_s15, %s2013_s4 }
 0x2f4   :  { %p1499_p11 = pnand %p1497_p10, %p1494_p9 }
 0x2f6   :  { %1502 = shalt.err (!%p1499_p11)
}
 0x2f7   :  { %1098 = dma.vmem_to_hbm [thread:$0]  %s1093_s12, 2048, %s2013_s4, [#allocation4], %s1513_s27, %s1513_s27, %s1514_s28  }
 0x2f8   :  { %1509 = dma.done.wait [#allocation4], 2048  }
 0x2f9   :  { %1510 = vsyncadd [#allocation4], 4294965248 }
 0x2fa   :  { %1102 = vsyncpa [#allocation3], 1 }
 0x2fb   :  { %1103 = vsyncpa [#allocation6], 1 }
 0x2fc   :  { %1104 = vsyncpa [#allocation9], 1 }
 0x2fd   :  { %1105 = vsyncpa [#allocation4], 1 }

</bundles_post_ra>
